<compile_context>
chip_gen: v7x
topology: tpu7x:2x2x1
jax: 0.10.0
libtpu: 0.0.40
codegen_flags: <defaults>
</compile_context>

<pallas_src>
import jax
import jax.numpy as jnp
from jax import lax
from jax.experimental import pallas as pl
from jax.experimental.pallas import tpu as pltpu


def lstm_pos_kernel(ids_ref, emb_ref, wih_ref, whh_ref, b_ref, wtag_ref,
                    btag_ref, out_ref):
    S = ids_ref.shape[0]
    V = emb_ref.shape[0]
    H = whh_ref.shape[0]

    # ---- fused embedding gather: exact one-hot selection on the MXU ----
    ids = ids_ref[...]                                                  # (S, 1) int32
    vocab_iota = lax.broadcasted_iota(jnp.int32, (S, V), 1)             # (S, V)
    one_hot = jnp.where(vocab_iota == ids, 1.0, 0.0).astype(jnp.float32)
    embeds = jnp.dot(one_hot, emb_ref[...],
                     preferred_element_type=jnp.float32)                # (S, E)

    # ---- hoisted input projection: one (S,E)x(E,4H) matmul + bias ----
    pre_gates = (jnp.dot(embeds, wih_ref[...],
                         preferred_element_type=jnp.float32)
                 + b_ref[...])                                          # (S, 4H)
    # Pre-split rows so the per-step extraction is off the recurrent chain.
    pre_rows = [pre_gates[t:t + 1, :] for t in range(S)]                # S x (1, 4H)

    # Loop-invariant recurrent weight: loaded once, stays in vregs;
    # Mosaic keeps the MXU RHS resident across the unrolled steps.
    whh = whh_ref[...]                                                  # (H, 4H)

    # h / c carried in registers (no VMEM round-trips on the dependence chain).
    h = jnp.zeros((1, H), jnp.float32)
    c = jnp.zeros((1, H), jnp.float32)

    hs = []
    # Fully unrolled recurrence (S static & small -> full LLO visibility).
    for t in range(S):
        gates = pre_rows[t] + jnp.dot(h, whh,
                                      preferred_element_type=jnp.float32)  # (1, 4H)
        # sigmoid via exp + approx EUP reciprocal (no precise divide on chain);
        # two full-width EUP pushes (sigmoid, tanh) instead of four.
        sig = pl.reciprocal(1.0 + jnp.exp(-gates), approx=True)
        tnh = jnp.tanh(gates)
        i_g = sig[:, 0 * H:1 * H]
        f_g = sig[:, 1 * H:2 * H]
        g_g = tnh[:, 2 * H:3 * H]
        o_g = sig[:, 3 * H:4 * H]
        c = f_g * c + i_g * g_g
        h = o_g * jnp.tanh(c)
        hs.append(h)

    # One (S, H) slab instead of S masked per-step stores.
    hs_all = jnp.concatenate(hs, axis=0)                                # (S, H)

    # hidden2tag + numerically stable log_softmax(dim=1)
    tag = (jnp.dot(hs_all, wtag_ref[...],
                   preferred_element_type=jnp.float32)
           + btag_ref[...])                                             # (S, T)
    m = jnp.max(tag, axis=1, keepdims=True)
    lse = m + jnp.log(jnp.sum(jnp.exp(tag - m), axis=1, keepdims=True))
    out_ref[...] = tag - lse


def pack_lstm_pos_params(emb_table, w_ih, w_hh, b_ih, b_hh, w_tag, b_tag):
    """One-time layout prep (transpose/cast/bias-fold) hoisted off the forward path."""
    H = w_hh.shape[1]
    T = w_tag.shape[0]
    return (
        jnp.asarray(emb_table, jnp.float32),                 # (V, E)
        jnp.asarray(w_ih, jnp.float32).T,                    # (E, 4H)
        jnp.asarray(w_hh, jnp.float32).T,                    # (H, 4H)
        (jnp.asarray(b_ih, jnp.float32)
         + jnp.asarray(b_hh, jnp.float32)).reshape(1, 4 * H),  # (1, 4H)
        jnp.asarray(w_tag, jnp.float32).T,                   # (H, T)
        jnp.asarray(b_tag, jnp.float32).reshape(1, T),       # (1, T)
    )


@jax.jit
def lstm_pos_forward(sentence, emb_f32, w_ih_t, w_hh_t, b, w_tag_t, b_tag_row):
    S = sentence.shape[0]
    T = w_tag_t.shape[1]
    ids2d = sentence.reshape(S, 1).astype(jnp.int32)

    vmem_spec = lambda: pl.BlockSpec(memory_space=pltpu.MemorySpace.VMEM)
    return pl.pallas_call(
        lstm_pos_kernel,
        out_shape=jax.ShapeDtypeStruct((S, T), jnp.float32),
        in_specs=[vmem_spec() for _ in range(7)],
        out_specs=vmem_spec(),
    )(ids2d, emb_f32, w_ih_t, w_hh_t, b, w_tag_t, b_tag_row)


def lstm_pos_reference(sentence, emb_table, w_ih, w_hh, b_ih, b_hh, w_tag, b_tag):
    embeds = jnp.take(emb_table, sentence, axis=0)
    H = w_hh.shape[1]
    h = jnp.zeros((1, H), jnp.float32)
    c = jnp.zeros((1, H), jnp.float32)
    hs = []
    for t in range(embeds.shape[0]):
        x_t = embeds[t:t + 1]
        gates = x_t @ w_ih.T + b_ih + h @ w_hh.T + b_hh
        i_g = jax.nn.sigmoid(gates[:, 0 * H:1 * H])
        f_g = jax.nn.sigmoid(gates[:, 1 * H:2 * H])
        g_g = jnp.tanh(gates[:, 2 * H:3 * H])
        o_g = jax.nn.sigmoid(gates[:, 3 * H:4 * H])
        c = f_g * c + i_g * g_g
        h = o_g * jnp.tanh(c)
        hs.append(h)
    hs = jnp.concatenate(hs, axis=0)
    tag = hs @ w_tag.T + b_tag
    return jax.nn.log_softmax(tag, axis=1)


if __name__ == "__main__":
    # small shapes consistent with the module's forward (batch=1 sentence)
    VOCAB = 50
    EMB = 16      # embedding_dim
    HID = 32      # hidden_dim
    TAGS = 8      # tagset_size
    SEQ = 8       # sentence length

    key = jax.random.PRNGKey(0)
    ks = jax.random.split(key, 8)
    sentence = jax.random.randint(ks[0], (SEQ,), 0, VOCAB, dtype=jnp.int32)
    emb_table = jax.random.normal(ks[1], (VOCAB, EMB), jnp.float32) * 0.5
    w_ih = jax.random.normal(ks[2], (4 * HID, EMB), jnp.float32) * 0.1
    w_hh = jax.random.normal(ks[3], (4 * HID, HID), jnp.float32) * 0.1
    b_ih = jax.random.normal(ks[4], (4 * HID,), jnp.float32) * 0.1
    b_hh = jax.random.normal(ks[5], (4 * HID,), jnp.float32) * 0.1
    w_tag = jax.random.normal(ks[6], (TAGS, HID), jnp.float32) * 0.1
    b_tag = jax.random.normal(ks[7], (TAGS,), jnp.float32) * 0.1

    # one-time packing (outside the per-call forward path)
    packed = pack_lstm_pos_params(emb_table, w_ih, w_hh, b_ih, b_hh,
                                  w_tag, b_tag)
    packed = jax.block_until_ready(packed)

    out = lstm_pos_forward(sentence, *packed)
    out = jax.block_until_ready(out)

    ref = lstm_pos_reference(sentence, emb_table, w_ih, w_hh, b_ih, b_hh,
                             w_tag, b_tag)
    assert out.shape == (SEQ, TAGS)
    # tolerance loosened slightly to accommodate the approx-EUP sigmoid
    assert jnp.allclose(out, ref, atol=1e-3, rtol=1e-3), "mismatch vs reference"
    print("KERNEL_OK")
</pallas_src>

<mosaic_0001>
module attributes {stable_mosaic.version = 11 : i64} {
  func.func @lstm_pos_kernel(%arg0: memref<8x1xi32, #tpu.memory_space<vmem>>, %arg1: memref<50x16xf32, #tpu.memory_space<vmem>>, %arg2: memref<16x128xf32, #tpu.memory_space<vmem>>, %arg3: memref<32x128xf32, #tpu.memory_space<vmem>>, %arg4: memref<1x128xf32, #tpu.memory_space<vmem>>, %arg5: memref<32x8xf32, #tpu.memory_space<vmem>>, %arg6: memref<1x8xf32, #tpu.memory_space<vmem>>, %arg7: memref<8x8xf32, #tpu.memory_space<vmem>>) attributes {dimension_semantics = [], scalar_prefetch = 0 : i64, scratch_operands = 0 : i64, tpu.core_type = #tpu.core_type<tc>} {
    %c0 = arith.constant 0 : index
    %c0_0 = arith.constant 0 : index
    %0 = vector.load %arg0[%c0, %c0_0] : memref<8x1xi32, #tpu.memory_space<vmem>>, vector<8x1xi32>
    %1 = tpu.iota {dimensions = array<i32: 1>} : vector<8x50xi32>
    %2 = vector.broadcast %0 : vector<8x1xi32> to vector<8x50xi32>
    %3 = arith.cmpi eq, %1, %2 : vector<8x50xi32>
    %cst = arith.constant 1.000000e+00 : f32
    %cst_1 = arith.constant 0.000000e+00 : f32
    %4 = vector.broadcast %cst : f32 to vector<8x50xf32>
    %5 = vector.broadcast %cst_1 : f32 to vector<8x50xf32>
    %6 = arith.select %3, %4, %5 : vector<8x50xi1>, vector<8x50xf32>
    %c0_2 = arith.constant 0 : index
    %c0_3 = arith.constant 0 : index
    %7 = vector.load %arg1[%c0_2, %c0_3] : memref<50x16xf32, #tpu.memory_space<vmem>>, vector<50x16xf32>
    %cst_4 = arith.constant dense<0.000000e+00> : vector<8x16xf32>
    %8 = tpu.matmul %6, %7, %cst_4 {dimension_numbers = #tpu.dot_dimension_numbers<[1], [0], [0], [1], [0, 0, 1, 1], [], []>} : vector<8x50xf32>, vector<50x16xf32>, vector<8x16xf32> -> vector<8x16xf32>
    %c0_5 = arith.constant 0 : index
    %c0_6 = arith.constant 0 : index
    %9 = vector.load %arg2[%c0_5, %c0_6] : memref<16x128xf32, #tpu.memory_space<vmem>>, vector<16x128xf32>
    %cst_7 = arith.constant dense<0.000000e+00> : vector<8x128xf32>
    %10 = tpu.matmul %8, %9, %cst_7 {dimension_numbers = #tpu.dot_dimension_numbers<[1], [0], [0], [1], [0, 0, 1, 1], [], []>} : vector<8x16xf32>, vector<16x128xf32>, vector<8x128xf32> -> vector<8x128xf32>
    %c0_8 = arith.constant 0 : index
    %c0_9 = arith.constant 0 : index
    %11 = vector.load %arg4[%c0_8, %c0_9] : memref<1x128xf32, #tpu.memory_space<vmem>>, vector<1x128xf32>
    %12 = vector.broadcast %11 : vector<1x128xf32> to vector<8x128xf32>
    %13 = arith.addf %10, %12 : vector<8x128xf32>
    %14 = vector.extract_strided_slice %13 {offsets = [0, 0], sizes = [1, 128], strides = [1, 1]} : vector<8x128xf32> to vector<1x128xf32>
    %15 = vector.extract_strided_slice %13 {offsets = [1, 0], sizes = [1, 128], strides = [1, 1]} : vector<8x128xf32> to vector<1x128xf32>
    %16 = vector.extract_strided_slice %13 {offsets = [2, 0], sizes = [1, 128], strides = [1, 1]} : vector<8x128xf32> to vector<1x128xf32>
    %17 = vector.extract_strided_slice %13 {offsets = [3, 0], sizes = [1, 128], strides = [1, 1]} : vector<8x128xf32> to vector<1x128xf32>
    %18 = vector.extract_strided_slice %13 {offsets = [4, 0], sizes = [1, 128], strides = [1, 1]} : vector<8x128xf32> to vector<1x128xf32>
    %19 = vector.extract_strided_slice %13 {offsets = [5, 0], sizes = [1, 128], strides = [1, 1]} : vector<8x128xf32> to vector<1x128xf32>
    %20 = vector.extract_strided_slice %13 {offsets = [6, 0], sizes = [1, 128], strides = [1, 1]} : vector<8x128xf32> to vector<1x128xf32>
    %21 = vector.extract_strided_slice %13 {offsets = [7, 0], sizes = [1, 128], strides = [1, 1]} : vector<8x128xf32> to vector<1x128xf32>
    %c0_10 = arith.constant 0 : index
    %c0_11 = arith.constant 0 : index
    %22 = vector.load %arg3[%c0_10, %c0_11] : memref<32x128xf32, #tpu.memory_space<vmem>>, vector<32x128xf32>
    %cst_12 = arith.constant 0.000000e+00 : f32
    %23 = vector.broadcast %cst_12 : f32 to vector<1x32xf32>
    %cst_13 = arith.constant 0.000000e+00 : f32
    %24 = vector.broadcast %cst_13 : f32 to vector<1x32xf32>
    %cst_14 = arith.constant dense<0.000000e+00> : vector<1x128xf32>
    %25 = tpu.matmul %23, %22, %cst_14 {dimension_numbers = #tpu.dot_dimension_numbers<[1], [0], [0], [1], [0, 0, 1, 1], [], []>} : vector<1x32xf32>, vector<32x128xf32>, vector<1x128xf32> -> vector<1x128xf32>
    %26 = arith.addf %14, %25 : vector<1x128xf32>
    %cst_15 = arith.constant 0.000000e+00 : f32
    %27 = vector.broadcast %cst_15 : f32 to vector<1x128xf32>
    %28 = arith.subf %27, %26 : vector<1x128xf32>
    %29 = math.exp %28 : vector<1x128xf32>
    %cst_16 = arith.constant 1.000000e+00 : f32
    %30 = vector.broadcast %cst_16 : f32 to vector<1x128xf32>
    %31 = arith.addf %30, %29 : vector<1x128xf32>
    %32 = tpu.reciprocal %31 {approx = true} : vector<1x128xf32> -> vector<1x128xf32>
    %33 = math.tanh %26 : vector<1x128xf32>
    %34 = vector.extract_strided_slice %32 {offsets = [0, 0], sizes = [1, 32], strides = [1, 1]} : vector<1x128xf32> to vector<1x32xf32>
    %35 = vector.extract_strided_slice %32 {offsets = [0, 32], sizes = [1, 32], strides = [1, 1]} : vector<1x128xf32> to vector<1x32xf32>
    %36 = vector.extract_strided_slice %33 {offsets = [0, 64], sizes = [1, 32], strides = [1, 1]} : vector<1x128xf32> to vector<1x32xf32>
    %37 = vector.extract_strided_slice %32 {offsets = [0, 96], sizes = [1, 32], strides = [1, 1]} : vector<1x128xf32> to vector<1x32xf32>
    %38 = arith.mulf %35, %24 : vector<1x32xf32>
    %39 = arith.mulf %34, %36 : vector<1x32xf32>
    %40 = arith.addf %38, %39 : vector<1x32xf32>
    %41 = math.tanh %40 : vector<1x32xf32>
    %42 = arith.mulf %37, %41 : vector<1x32xf32>
    %cst_17 = arith.constant dense<0.000000e+00> : vector<1x128xf32>
    %43 = tpu.matmul %42, %22, %cst_17 {dimension_numbers = #tpu.dot_dimension_numbers<[1], [0], [0], [1], [0, 0, 1, 1], [], []>} : vector<1x32xf32>, vector<32x128xf32>, vector<1x128xf32> -> vector<1x128xf32>
    %44 = arith.addf %15, %43 : vector<1x128xf32>
    %cst_18 = arith.constant 0.000000e+00 : f32
    %45 = vector.broadcast %cst_18 : f32 to vector<1x128xf32>
    %46 = arith.subf %45, %44 : vector<1x128xf32>
    %47 = math.exp %46 : vector<1x128xf32>
    %cst_19 = arith.constant 1.000000e+00 : f32
    %48 = vector.broadcast %cst_19 : f32 to vector<1x128xf32>
    %49 = arith.addf %48, %47 : vector<1x128xf32>
    %50 = tpu.reciprocal %49 {approx = true} : vector<1x128xf32> -> vector<1x128xf32>
    %51 = math.tanh %44 : vector<1x128xf32>
    %52 = vector.extract_strided_slice %50 {offsets = [0, 0], sizes = [1, 32], strides = [1, 1]} : vector<1x128xf32> to vector<1x32xf32>
    %53 = vector.extract_strided_slice %50 {offsets = [0, 32], sizes = [1, 32], strides = [1, 1]} : vector<1x128xf32> to vector<1x32xf32>
    %54 = vector.extract_strided_slice %51 {offsets = [0, 64], sizes = [1, 32], strides = [1, 1]} : vector<1x128xf32> to vector<1x32xf32>
    %55 = vector.extract_strided_slice %50 {offsets = [0, 96], sizes = [1, 32], strides = [1, 1]} : vector<1x128xf32> to vector<1x32xf32>
    %56 = arith.mulf %53, %40 : vector<1x32xf32>
    %57 = arith.mulf %52, %54 : vector<1x32xf32>
    %58 = arith.addf %56, %57 : vector<1x32xf32>
    %59 = math.tanh %58 : vector<1x32xf32>
    %60 = arith.mulf %55, %59 : vector<1x32xf32>
    %cst_20 = arith.constant dense<0.000000e+00> : vector<1x128xf32>
    %61 = tpu.matmul %60, %22, %cst_20 {dimension_numbers = #tpu.dot_dimension_numbers<[1], [0], [0], [1], [0, 0, 1, 1], [], []>} : vector<1x32xf32>, vector<32x128xf32>, vector<1x128xf32> -> vector<1x128xf32>
    %62 = arith.addf %16, %61 : vector<1x128xf32>
    %cst_21 = arith.constant 0.000000e+00 : f32
    %63 = vector.broadcast %cst_21 : f32 to vector<1x128xf32>
    %64 = arith.subf %63, %62 : vector<1x128xf32>
    %65 = math.exp %64 : vector<1x128xf32>
    %cst_22 = arith.constant 1.000000e+00 : f32
    %66 = vector.broadcast %cst_22 : f32 to vector<1x128xf32>
    %67 = arith.addf %66, %65 : vector<1x128xf32>
    %68 = tpu.reciprocal %67 {approx = true} : vector<1x128xf32> -> vector<1x128xf32>
    %69 = math.tanh %62 : vector<1x128xf32>
    %70 = vector.extract_strided_slice %68 {offsets = [0, 0], sizes = [1, 32], strides = [1, 1]} : vector<1x128xf32> to vector<1x32xf32>
    %71 = vector.extract_strided_slice %68 {offsets = [0, 32], sizes = [1, 32], strides = [1, 1]} : vector<1x128xf32> to vector<1x32xf32>
    %72 = vector.extract_strided_slice %69 {offsets = [0, 64], sizes = [1, 32], strides = [1, 1]} : vector<1x128xf32> to vector<1x32xf32>
    %73 = vector.extract_strided_slice %68 {offsets = [0, 96], sizes = [1, 32], strides = [1, 1]} : vector<1x128xf32> to vector<1x32xf32>
    %74 = arith.mulf %71, %58 : vector<1x32xf32>
    %75 = arith.mulf %70, %72 : vector<1x32xf32>
    %76 = arith.addf %74, %75 : vector<1x32xf32>
    %77 = math.tanh %76 : vector<1x32xf32>
    %78 = arith.mulf %73, %77 : vector<1x32xf32>
    %cst_23 = arith.constant dense<0.000000e+00> : vector<1x128xf32>
    %79 = tpu.matmul %78, %22, %cst_23 {dimension_numbers = #tpu.dot_dimension_numbers<[1], [0], [0], [1], [0, 0, 1, 1], [], []>} : vector<1x32xf32>, vector<32x128xf32>, vector<1x128xf32> -> vector<1x128xf32>
    %80 = arith.addf %17, %79 : vector<1x128xf32>
    %cst_24 = arith.constant 0.000000e+00 : f32
    %81 = vector.broadcast %cst_24 : f32 to vector<1x128xf32>
    %82 = arith.subf %81, %80 : vector<1x128xf32>
    %83 = math.exp %82 : vector<1x128xf32>
    %cst_25 = arith.constant 1.000000e+00 : f32
    %84 = vector.broadcast %cst_25 : f32 to vector<1x128xf32>
    %85 = arith.addf %84, %83 : vector<1x128xf32>
    %86 = tpu.reciprocal %85 {approx = true} : vector<1x128xf32> -> vector<1x128xf32>
    %87 = math.tanh %80 : vector<1x128xf32>
    %88 = vector.extract_strided_slice %86 {offsets = [0, 0], sizes = [1, 32], strides = [1, 1]} : vector<1x128xf32> to vector<1x32xf32>
    %89 = vector.extract_strided_slice %86 {offsets = [0, 32], sizes = [1, 32], strides = [1, 1]} : vector<1x128xf32> to vector<1x32xf32>
    %90 = vector.extract_strided_slice %87 {offsets = [0, 64], sizes = [1, 32], strides = [1, 1]} : vector<1x128xf32> to vector<1x32xf32>
    %91 = vector.extract_strided_slice %86 {offsets = [0, 96], sizes = [1, 32], strides = [1, 1]} : vector<1x128xf32> to vector<1x32xf32>
    %92 = arith.mulf %89, %76 : vector<1x32xf32>
    %93 = arith.mulf %88, %90 : vector<1x32xf32>
    %94 = arith.addf %92, %93 : vector<1x32xf32>
    %95 = math.tanh %94 : vector<1x32xf32>
    %96 = arith.mulf %91, %95 : vector<1x32xf32>
    %cst_26 = arith.constant dense<0.000000e+00> : vector<1x128xf32>
    %97 = tpu.matmul %96, %22, %cst_26 {dimension_numbers = #tpu.dot_dimension_numbers<[1], [0], [0], [1], [0, 0, 1, 1], [], []>} : vector<1x32xf32>, vector<32x128xf32>, vector<1x128xf32> -> vector<1x128xf32>
    %98 = arith.addf %18, %97 : vector<1x128xf32>
    %cst_27 = arith.constant 0.000000e+00 : f32
    %99 = vector.broadcast %cst_27 : f32 to vector<1x128xf32>
    %100 = arith.subf %99, %98 : vector<1x128xf32>
    %101 = math.exp %100 : vector<1x128xf32>
    %cst_28 = arith.constant 1.000000e+00 : f32
    %102 = vector.broadcast %cst_28 : f32 to vector<1x128xf32>
    %103 = arith.addf %102, %101 : vector<1x128xf32>
    %104 = tpu.reciprocal %103 {approx = true} : vector<1x128xf32> -> vector<1x128xf32>
    %105 = math.tanh %98 : vector<1x128xf32>
    %106 = vector.extract_strided_slice %104 {offsets = [0, 0], sizes = [1, 32], strides = [1, 1]} : vector<1x128xf32> to vector<1x32xf32>
    %107 = vector.extract_strided_slice %104 {offsets = [0, 32], sizes = [1, 32], strides = [1, 1]} : vector<1x128xf32> to vector<1x32xf32>
    %108 = vector.extract_strided_slice %105 {offsets = [0, 64], sizes = [1, 32], strides = [1, 1]} : vector<1x128xf32> to vector<1x32xf32>
    %109 = vector.extract_strided_slice %104 {offsets = [0, 96], sizes = [1, 32], strides = [1, 1]} : vector<1x128xf32> to vector<1x32xf32>
    %110 = arith.mulf %107, %94 : vector<1x32xf32>
    %111 = arith.mulf %106, %108 : vector<1x32xf32>
    %112 = arith.addf %110, %111 : vector<1x32xf32>
    %113 = math.tanh %112 : vector<1x32xf32>
    %114 = arith.mulf %109, %113 : vector<1x32xf32>
    %cst_29 = arith.constant dense<0.000000e+00> : vector<1x128xf32>
    %115 = tpu.matmul %114, %22, %cst_29 {dimension_numbers = #tpu.dot_dimension_numbers<[1], [0], [0], [1], [0, 0, 1, 1], [], []>} : vector<1x32xf32>, vector<32x128xf32>, vector<1x128xf32> -> vector<1x128xf32>
    %116 = arith.addf %19, %115 : vector<1x128xf32>
    %cst_30 = arith.constant 0.000000e+00 : f32
    %117 = vector.broadcast %cst_30 : f32 to vector<1x128xf32>
    %118 = arith.subf %117, %116 : vector<1x128xf32>
    %119 = math.exp %118 : vector<1x128xf32>
    %cst_31 = arith.constant 1.000000e+00 : f32
    %120 = vector.broadcast %cst_31 : f32 to vector<1x128xf32>
    %121 = arith.addf %120, %119 : vector<1x128xf32>
    %122 = tpu.reciprocal %121 {approx = true} : vector<1x128xf32> -> vector<1x128xf32>
    %123 = math.tanh %116 : vector<1x128xf32>
    %124 = vector.extract_strided_slice %122 {offsets = [0, 0], sizes = [1, 32], strides = [1, 1]} : vector<1x128xf32> to vector<1x32xf32>
    %125 = vector.extract_strided_slice %122 {offsets = [0, 32], sizes = [1, 32], strides = [1, 1]} : vector<1x128xf32> to vector<1x32xf32>
    %126 = vector.extract_strided_slice %123 {offsets = [0, 64], sizes = [1, 32], strides = [1, 1]} : vector<1x128xf32> to vector<1x32xf32>
    %127 = vector.extract_strided_slice %122 {offsets = [0, 96], sizes = [1, 32], strides = [1, 1]} : vector<1x128xf32> to vector<1x32xf32>
    %128 = arith.mulf %125, %112 : vector<1x32xf32>
    %129 = arith.mulf %124, %126 : vector<1x32xf32>
    %130 = arith.addf %128, %129 : vector<1x32xf32>
    %131 = math.tanh %130 : vector<1x32xf32>
    %132 = arith.mulf %127, %131 : vector<1x32xf32>
    %cst_32 = arith.constant dense<0.000000e+00> : vector<1x128xf32>
    %133 = tpu.matmul %132, %22, %cst_32 {dimension_numbers = #tpu.dot_dimension_numbers<[1], [0], [0], [1], [0, 0, 1, 1], [], []>} : vector<1x32xf32>, vector<32x128xf32>, vector<1x128xf32> -> vector<1x128xf32>
    %134 = arith.addf %20, %133 : vector<1x128xf32>
    %cst_33 = arith.constant 0.000000e+00 : f32
    %135 = vector.broadcast %cst_33 : f32 to vector<1x128xf32>
    %136 = arith.subf %135, %134 : vector<1x128xf32>
    %137 = math.exp %136 : vector<1x128xf32>
    %cst_34 = arith.constant 1.000000e+00 : f32
    %138 = vector.broadcast %cst_34 : f32 to vector<1x128xf32>
    %139 = arith.addf %138, %137 : vector<1x128xf32>
    %140 = tpu.reciprocal %139 {approx = true} : vector<1x128xf32> -> vector<1x128xf32>
    %141 = math.tanh %134 : vector<1x128xf32>
    %142 = vector.extract_strided_slice %140 {offsets = [0, 0], sizes = [1, 32], strides = [1, 1]} : vector<1x128xf32> to vector<1x32xf32>
    %143 = vector.extract_strided_slice %140 {offsets = [0, 32], sizes = [1, 32], strides = [1, 1]} : vector<1x128xf32> to vector<1x32xf32>
    %144 = vector.extract_strided_slice %141 {offsets = [0, 64], sizes = [1, 32], strides = [1, 1]} : vector<1x128xf32> to vector<1x32xf32>
    %145 = vector.extract_strided_slice %140 {offsets = [0, 96], sizes = [1, 32], strides = [1, 1]} : vector<1x128xf32> to vector<1x32xf32>
    %146 = arith.mulf %143, %130 : vector<1x32xf32>
    %147 = arith.mulf %142, %144 : vector<1x32xf32>
    %148 = arith.addf %146, %147 : vector<1x32xf32>
    %149 = math.tanh %148 : vector<1x32xf32>
    %150 = arith.mulf %145, %149 : vector<1x32xf32>
    %cst_35 = arith.constant dense<0.000000e+00> : vector<1x128xf32>
    %151 = tpu.matmul %150, %22, %cst_35 {dimension_numbers = #tpu.dot_dimension_numbers<[1], [0], [0], [1], [0, 0, 1, 1], [], []>} : vector<1x32xf32>, vector<32x128xf32>, vector<1x128xf32> -> vector<1x128xf32>
    %152 = arith.addf %21, %151 : vector<1x128xf32>
    %cst_36 = arith.constant 0.000000e+00 : f32
    %153 = vector.broadcast %cst_36 : f32 to vector<1x128xf32>
    %154 = arith.subf %153, %152 : vector<1x128xf32>
    %155 = math.exp %154 : vector<1x128xf32>
    %cst_37 = arith.constant 1.000000e+00 : f32
    %156 = vector.broadcast %cst_37 : f32 to vector<1x128xf32>
    %157 = arith.addf %156, %155 : vector<1x128xf32>
    %158 = tpu.reciprocal %157 {approx = true} : vector<1x128xf32> -> vector<1x128xf32>
    %159 = math.tanh %152 : vector<1x128xf32>
    %160 = vector.extract_strided_slice %158 {offsets = [0, 0], sizes = [1, 32], strides = [1, 1]} : vector<1x128xf32> to vector<1x32xf32>
    %161 = vector.extract_strided_slice %158 {offsets = [0, 32], sizes = [1, 32], strides = [1, 1]} : vector<1x128xf32> to vector<1x32xf32>
    %162 = vector.extract_strided_slice %159 {offsets = [0, 64], sizes = [1, 32], strides = [1, 1]} : vector<1x128xf32> to vector<1x32xf32>
    %163 = vector.extract_strided_slice %158 {offsets = [0, 96], sizes = [1, 32], strides = [1, 1]} : vector<1x128xf32> to vector<1x32xf32>
    %164 = arith.mulf %161, %148 : vector<1x32xf32>
    %165 = arith.mulf %160, %162 : vector<1x32xf32>
    %166 = arith.addf %164, %165 : vector<1x32xf32>
    %167 = math.tanh %166 : vector<1x32xf32>
    %168 = arith.mulf %163, %167 : vector<1x32xf32>
    %169 = tpu.concatenate %42, %60, %78, %96, %114, %132, %150, %168 in 0 : vector<1x32xf32>, vector<1x32xf32>, vector<1x32xf32>, vector<1x32xf32>, vector<1x32xf32>, vector<1x32xf32>, vector<1x32xf32>, vector<1x32xf32> -> vector<8x32xf32>
    %c0_38 = arith.constant 0 : index
    %c0_39 = arith.constant 0 : index
    %170 = vector.load %arg5[%c0_38, %c0_39] : memref<32x8xf32, #tpu.memory_space<vmem>>, vector<32x8xf32>
    %cst_40 = arith.constant dense<0.000000e+00> : vector<8x8xf32>
    %171 = tpu.matmul %169, %170, %cst_40 {dimension_numbers = #tpu.dot_dimension_numbers<[1], [0], [0], [1], [0, 0, 1, 1], [], []>} : vector<8x32xf32>, vector<32x8xf32>, vector<8x8xf32> -> vector<8x8xf32>
    %c0_41 = arith.constant 0 : index
    %c0_42 = arith.constant 0 : index
    %172 = vector.load %arg6[%c0_41, %c0_42] : memref<1x8xf32, #tpu.memory_space<vmem>>, vector<1x8xf32>
    %173 = vector.broadcast %172 : vector<1x8xf32> to vector<8x8xf32>
    %174 = arith.addf %171, %173 : vector<8x8xf32>
    %cst_43 = arith.constant dense<0xFF800000> : vector<8xf32>
    %175 = vector.multi_reduction <maximumf>, %174, %cst_43 [1] : vector<8x8xf32> to vector<8xf32>
    %176 = vector.shape_cast %175 : vector<8xf32> to vector<8x1xf32>
    %177 = vector.broadcast %176 : vector<8x1xf32> to vector<8x8xf32>
    %178 = arith.subf %174, %177 : vector<8x8xf32>
    %179 = math.exp %178 : vector<8x8xf32>
    %cst_44 = arith.constant dense<0.000000e+00> : vector<8xf32>
    %180 = vector.multi_reduction <add>, %179, %cst_44 [1] : vector<8x8xf32> to vector<8xf32>
    %181 = vector.shape_cast %180 : vector<8xf32> to vector<8x1xf32>
    %182 = math.log %181 : vector<8x1xf32>
    %183 = arith.addf %176, %182 : vector<8x1xf32>
    %184 = vector.broadcast %183 : vector<8x1xf32> to vector<8x8xf32>
    %185 = arith.subf %174, %184 : vector<8x8xf32>
    %c0_45 = arith.constant 0 : index
    %c0_46 = arith.constant 0 : index
    %186 = vector.load %arg7[%c0_45, %c0_46] : memref<8x8xf32, #tpu.memory_space<vmem>>, vector<8x8xf32>
    tpu.vector_store %arg7[%c0_45, %c0_46], %185 {strides = array<i32>} : memref<8x8xf32, #tpu.memory_space<vmem>>, vector<8x8xf32>,
    return
  }
}

</mosaic_0001>

<bundles_post_ra>
// kernel: lstm_pos_forward.1
= control target key start
LH: loop header
LB: loop body
LE: loop exit
PB: predicated region body
PF: predicated region fallthrough
CT: control target
= control target key end

     0   :  { %v1532_v3 = vmov 0   ;;  %v1533_v4 = vmov 0.0|0.0   ;;  %vm1534_vm0 = vmmov 0   ;;  %v1535_v10 = vmov 0.0   ;;  %s1777_s0 = inlined_call_operand.vmem [shape: s32[8,1], index: 0, kind: input, shape index: {}]   ;;  %s1778_s1 = inlined_call_operand.vmem [shape: f32[50,16], index: 1, kind: input, shape index: {}]   ;;  %s1779_s2 = inlined_call_operand.vmem [shape: f32[16,128], index: 2, kind: input, shape index: {}]   ;;  %s1780_s3 = inlined_call_operand.vmem [shape: f32[32,128], index: 3, kind: input, shape index: {}]   ;;  %s1781_s4 = inlined_call_operand.vmem [shape: f32[1,128], index: 4, kind: input, shape index: {}]   ;;  %s1782_s5 = inlined_call_operand.vmem [shape: f32[32,8], index: 5, kind: input, shape index: {}]   ;;  %s1783_s6 = inlined_call_operand.vmem [shape: f32[1,8], index: 6, kind: input, shape index: {}]   ;;  %s1784_s7 = inlined_call_operand.hbm [shape: f32[8,8], index: 7, kind: output, shape index: {}]  }
   0x1   :  { %v27_v0 = vld [vmem:[%s1777_s0] sm:$0xff]  ;;  %v36_v2 = vld [vmem:[%s1778_s1 + $0x8] sm:$0xff]  ;;  %1439 = vset.pattern.permute.xlu0 %v1532_v3  ;;  %1366 = vmatprep.subr.bf16.mxu0 %v1533_v4  ;;  %v37_v6 = vld [vmem:[%s1778_s1 + $0x10] sm:$0xff] }
   0x2   :  { %v35_v1 = vld [vmem:[%s1778_s1] sm:$0xff]  ;;  %v38_v7 = vld [vmem:[%s1778_s1 + $0x18] sm:$0xff]  ;;  %31 = vperm.xlu0 %1439, %v27_v0   ;;  %1375 = vmatprep.subr.bf16.mxu1 %v1533_v4 }
   0x3   :  { %v1367_v5 = vpack.c.bf16 %v36_v2, %v35_v1  ;;  %v1370_v8 = vpack.c.bf16 %v38_v7, %v37_v6  ;;  %v39_v9 = vld [vmem:[%s1778_s1 + $0x20] sm:$0xff]  ;;  %1257 = vmatprep.mubr.msk.f32.mxu0 %vm1534_vm0, %v1535_v10 }
   0x5   :  { %1368 = vmatpush3.bf16.msra.mxu0 %v1367_v5 }
   0x6   :  { %12 = vsyncpa [#allocation3], 0  ;;  %1369 = vmatprep.subr.bf16.mxu0 %v1533_v4  ;;  %v40_v11 = vld [vmem:[%s1778_s1 + $0x28] sm:$0xff]  ;;  %v120_v12 = vld [vmem:[%s1779_s2] sm:$0xff]  ;;  %1264 = vmatprep.mubr.msk.f32.mxu1 %vm1534_vm0, %v1535_v10  ;;  %vm46_vm1 = vcmask 1041408   ;;  %v28_v17 = vlaneseq  ;;  %vm42_vm2 = vcmask 408576  }
   0x7   :  { %v121_v13 = vld [vmem:[%s1779_s2 + $0x8] sm:$0xff]  ;;  %v1373_v15 = vpack.c.bf16 %v40_v11, %v39_v9  ;;  %v41_v16 = vld [vmem:[%s1778_s1 + $0x30] sm:$0x3]  ;;  %v203_v21 = vld [vmem:[%s1780_s3] sm:$0xff]  ;;  %vm129_vm4 = vcmask 130048   ;;  %s1536_s27 = smov 64  }
   0x8   :  { %v1376_v14 = vpack.c.bf16 %v121_v13, %v120_v12  ;;  %v29_v18 = vand.u32 127, %v28_v17  ;;  %v204_v22 = vld [vmem:[%s1780_s3 + $0x8] sm:$0xff]  ;;  %v205_v24 = vld [vmem:[%s1780_s3 + $0x10] sm:$0xff]  ;;  %v206_v25 = vld [vmem:[%s1780_s3 + $0x18] sm:$0xff]  ;;  %vm207_vm5 = vcmask 261120   ;;  %vm1046_vm6 = vcmask 1040384  }
   0x9   :  { %1371 = vmatpush3.bf16.msra.mxu0 %v1370_v8  ;;  %v1630_v23 = vpack.c.bf16 %v204_v22, %v203_v21  ;;  %v1640_v26 = vpack.c.bf16 %v206_v25, %v205_v24  ;;  %v1176_v31 = vld [vmem:[%s1781_s4] ss:$0 sm:$0xff]  ;;  %s1537_s4 = smov 32   ;;  %vm1049_vm7 = vcmask 1042432   ;;  %vm1051_vm8 = vcmask 1043456  }
   0xa   :  { %1377 = vmatpush3.bf16.msra.mxu1 %v1376_v14  ;;  %1372 = vmatprep.subr.bf16.mxu0 %v1533_v4  ;;  %vm1053_vm9 = vcmask 1044480   ;;  %vm1055_vm10 = vcmask 1045504   ;;  %vm1057_vm11 = vcmask 1046528   ;;  %vm1145_vm12 = vcmask 64512  }
   0xb   :  { %1378 = vmatprep.subr.bf16.mxu1 %v1533_v4 }
   0xd   :  { %1374 = vmatpush3.bf16.msra.mxu0 %v1373_v15 }
   0xe   :  { %1255 = vmatprep.subr.mxu0 %v1535_v10 }
  0x11   :  { %1256 = vmatpush3.msk.msra.mxu0 %vm46_vm1, %v41_v16 }
  0x12   :  { %1390 = vmatprep.subr.bf16.mxu0 %v1533_v4 }
  0x81   :  { %v32_v19 = vpop.permute.xlu0 %31 }
  0x82   :  { %vm33_vm3 = vcmp.eq.s32.totalorder %v29_v18, %v32_v19 }
  0x83   :  { %v34_v20 = vsel %vm33_vm3, 1.0, %v1535_v10 }
  0x84   :  { %1258 = vmatmul.mubr.msk.f32.vlgmr.msra.gmra.mrb[0].mxu0 %vm42_vm2, %v34_v20 }
  0x85   :  { %1297 = vmatprep.mubr.msk.f32.mxu0 %vm1534_vm0, %v1535_v10  ;;  %1392 = vmatpush3.bf16.msra.mxu0 %v1630_v23 }
  0x86   :  { %1393 = vmatprep.subr.bf16.mxu0 %v1533_v4 }
  0x89   :  { %1395 = vmatpush3.bf16.msra.mxu0 %v1640_v26 }
  0x8a   :  { %1402 = vmatprep.subr.bf16.mxu0 %v1533_v4 }
 0x157   :  { %v116_v27 = vpop.f32.mrb[0].mxu0 }
 0x158   :  { %v1259_v28 = vpop.f32.mrb[1].mxu0  ;;  %1265 = vmatmul.mubr.msk.f32.vlgmr.msra.gmra.mrb[0].mxu1 %vm129_vm4, %v116_v27 }
 0x159   :  { %1380 = vmatpush3.bf16.msra.mxu1 %v1630_v23  ;;  %1275 = vmatprep.mubr.msk.f32.mxu1 %vm1534_vm0, %v1535_v10 }
 0x15a   :  { %1381 = vmatprep.subr.bf16.mxu1 %v1533_v4 }
 0x15d   :  { %1383 = vmatpush3.bf16.msra.mxu1 %v1640_v26 }
 0x15e   :  { %1384 = vmatprep.subr.bf16.mxu1 %v1533_v4 }
 0x160   :  { %1276 = vmatmul.mubr.f32.vlgmr.msra.gmra.mrb[2].mxu1 %v1535_v10 }
 0x161   :  { %1386 = vmatpush3.bf16.msra.mxu1 %v1630_v23  ;;  %1286 = vmatprep.mubr.msk.f32.mxu1 %vm1534_vm0, %v1535_v10 }
 0x162   :  { %1387 = vmatprep.subr.bf16.mxu1 %v1533_v4 }
 0x165   :  { %1389 = vmatpush3.bf16.msra.mxu1 %v1640_v26 }
 0x166   :  { %1396 = vmatprep.subr.bf16.mxu1 %v1533_v4 }
 0x22b   :  { %v199_v29 = vpop.f32.mrb[0].mxu1 }
 0x22c   :  { %v1266_v30 = vpop.f32.mrb[1].mxu1  ;;  %v1660_v32 = vadd.f32 %v1176_v31, %v199_v29 }
 0x233   :  { %v277_v33 = vpop.f32.mrb[2].mxu1 }
 0x234   :  { %v281_v34 = vadd.f32 %v277_v33, %v1660_v32  ;;  %v1277_v35 = vpop.f32.mrb[3].mxu1 }
 0x236   :  { %1440 = vtanh.f32 %v281_v34  ;;  %v282_v37 = vsub.f32 0.0, %v281_v34 }
 0x238   :  { %v283_v38 = vmul.f32 1.442695, %v282_v37 }
 0x23a   :  { %1442 = vpow2.f32 %v283_v38 }
 0x240   :  { %v1441_v36 = vpop.eup %1440 }
 0x241   :  { %290 = vrot.lane.b32.xlu0 %v1441_v36, %s1536_s27 }
 0x244   :  { %v1443_v39 = vpop.eup %1442 }
 0x245   :  { %v285_v40 = vadd.f32 1.0, %v1443_v39 }
 0x247   :  { %1444 = vrcp.f32 %v285_v40 }
 0x251   :  { %v1445_v41 = vpop.eup %1444 }
 0x252   :  { %v288_v44 = vmul.f32 0.0, %v1445_v41 }
 0x2b3   :  { %v291_v42 = vpop.permute.xlu0 %290 }
 0x2b4   :  { %v293_v43 = vmul.f32 %v1445_v41, %v291_v42 }
 0x2b6   :  { %295 = vrot.lane.b32.xlu1 %v293_v43, %s1537_s4 }
 0x328   :  { %v296_v45 = vpop.permute.xlu1 %295 }
 0x329   :  { %v298_v46 = vadd.f32 %v296_v45, %v288_v44 }
 0x32b   :  { %1446 = vtanh.f32 %v298_v46  ;;  %v391_v63 = vrot.slane %v298_v46, 7 }
 0x335   :  { %v1447_v47 = vpop.eup %1446 }
 0x336   :  { %301 = vrot.lane.b32.xlu1 %v1447_v47, %s1536_s27 }
 0x3a8   :  { %v302_v48 = vpop.permute.xlu1 %301 }
 0x3a9   :  { %v1666_v49 = vmul.f32 %v1445_v41, %v302_v48 }
 0x3ab   :  { %306 = vrot.lane.b32.xlu0 %v1666_v49, %s1537_s4 }
 0x41d   :  { %v307_v50 = vpop.permute.xlu0 %306 }
 0x41e   :  { %1287 = vmatmul.mubr.msk.f32.vlgmr.msra.gmra.mrb[4].mxu1 %vm207_vm5, %v307_v50 }
 0x41f   :  { %1398 = vmatpush3.bf16.msra.mxu1 %v1630_v23  ;;  %1308 = vmatprep.mubr.msk.f32.mxu1 %vm1534_vm0, %v1535_v10 }
 0x420   :  { %1399 = vmatprep.subr.bf16.mxu1 %v1533_v4 }
 0x423   :  { %1401 = vmatpush3.bf16.msra.mxu1 %v1640_v26 }
 0x424   :  { %1408 = vmatprep.subr.bf16.mxu1 %v1533_v4 }
 0x4f1   :  { %v376_v51 = vpop.f32.mrb[4].mxu1 }
 0x4f2   :  { %v381_v52 = vrot.slane %v376_v51, 7  ;;  %v1288_v53 = vpop.f32.mrb[5].mxu1 }
 0x4f4   :  { %v383_v54 = vadd.f32 %v381_v52, %v1660_v32 }
 0x4f6   :  { %1448 = vtanh.f32 %v383_v54  ;;  %v384_v56 = vsub.f32 0.0, %v383_v54 }
 0x4f8   :  { %v385_v57 = vmul.f32 1.442695, %v384_v56 }
 0x4fa   :  { %1450 = vpow2.f32 %v385_v57 }
 0x500   :  { %v1449_v55 = vpop.eup %1448 }
 0x501   :  { %395 = vrot.lane.b32.xlu1 %v1449_v55, %s1536_s27 }
 0x504   :  { %v1451_v58 = vpop.eup %1450 }
 0x505   :  { %v387_v59 = vadd.f32 1.0, %v1451_v58 }
 0x507   :  { %1452 = vrcp.f32 %v387_v59 }
 0x511   :  { %v1453_v60 = vpop.eup %1452 }
 0x512   :  { %v393_v0 = vmul.f32 %v1453_v60, %v391_v63 }
 0x573   :  { %v396_v61 = vpop.permute.xlu1 %395 }
 0x574   :  { %v398_v62 = vmul.f32 %v1453_v60, %v396_v61 }
 0x576   :  { %400 = vrot.lane.b32.xlu0 %v398_v62, %s1537_s4 }
 0x5e8   :  { %v401_v1 = vpop.permute.xlu0 %400 }
 0x5e9   :  { %v403_v2 = vadd.f32 %v401_v1, %v393_v0 }
 0x5eb   :  { %1454 = vtanh.f32 %v403_v2  ;;  %v497_v22 = vrot.slane %v403_v2, 7 }
 0x5f5   :  { %v1455_v3 = vpop.eup %1454 }
 0x5f6   :  { %406 = vrot.lane.b32.xlu1 %v1455_v3, %s1536_s27 }
 0x668   :  { %v407_v5 = vpop.permute.xlu1 %406 }
 0x669   :  { %v409_v6 = vmul.f32 %v1453_v60, %v407_v5 }
 0x66b   :  { %v411_v7 = vrot.slane %v409_v6, 1  ;;  %v1047_v31 = vsel %vm1046_vm6, %v1666_v49, %v409_v6 }
 0x66d   :  { %412 = vrot.lane.b32.xlu0 %v411_v7, %s1537_s4 }
 0x6df   :  { %v413_v8 = vpop.permute.xlu0 %412 }
 0x6e0   :  { %1298 = vmatmul.mubr.msk.f32.vlgmr.msra.gmra.mrb[2].mxu0 %vm207_vm5, %v413_v8 }
 0x6e1   :  { %1404 = vmatpush3.bf16.msra.mxu0 %v1630_v23  ;;  %1319 = vmatprep.mubr.msk.f32.mxu0 %vm1534_vm0, %v1535_v10 }
 0x6e2   :  { %1405 = vmatprep.subr.bf16.mxu0 %v1533_v4 }
 0x6e5   :  { %1407 = vmatpush3.bf16.msra.mxu0 %v1640_v26 }
 0x6e6   :  { %1414 = vmatprep.subr.bf16.mxu0 %v1533_v4 }
 0x7b3   :  { %v482_v9 = vpop.f32.mrb[2].mxu0 }
 0x7b4   :  { %v487_v11 = vrot.slane %v482_v9, 6  ;;  %v1299_v12 = vpop.f32.mrb[3].mxu0 }
 0x7b6   :  { %v489_v13 = vadd.f32 %v487_v11, %v1660_v32 }
 0x7b8   :  { %1456 = vtanh.f32 %v489_v13  ;;  %v490_v15 = vsub.f32 0.0, %v489_v13 }
 0x7ba   :  { %v491_v16 = vmul.f32 1.442695, %v490_v15 }
 0x7bc   :  { %1458 = vpow2.f32 %v491_v16 }
 0x7c2   :  { %v1457_v14 = vpop.eup %1456 }
 0x7c3   :  { %501 = vrot.lane.b32.xlu1 %v1457_v14, %s1536_s27 }
 0x7c6   :  { %v1459_v17 = vpop.eup %1458 }
 0x7c7   :  { %v493_v18 = vadd.f32 1.0, %v1459_v17 }
 0x7c9   :  { %1460 = vrcp.f32 %v493_v18 }
 0x7d3   :  { %v1461_v19 = vpop.eup %1460 }
 0x7d4   :  { %v499_v24 = vmul.f32 %v1461_v19, %v497_v22 }
 0x835   :  { %v502_v20 = vpop.permute.xlu1 %501 }
 0x836   :  { %v504_v21 = vmul.f32 %v1461_v19, %v502_v20 }
 0x838   :  { %506 = vrot.lane.b32.xlu0 %v504_v21, %s1537_s4 }
 0x8aa   :  { %v507_v25 = vpop.permute.xlu0 %506 }
 0x8ab   :  { %v509_v27 = vadd.f32 %v507_v25, %v499_v24 }
 0x8ad   :  { %1462 = vtanh.f32 %v509_v27  ;;  %v603_v48 = vrot.slane %v509_v27, 7 }
 0x8b7   :  { %v1463_v28 = vpop.eup %1462 }
 0x8b8   :  { %512 = vrot.lane.b32.xlu1 %v1463_v28, %s1536_s27 }
 0x92a   :  { %v513_v29 = vpop.permute.xlu1 %512 }
 0x92b   :  { %v515_v30 = vmul.f32 %v1461_v19, %v513_v29 }
 0x92d   :  { %v517_v33 = vrot.slane %v515_v30, 2  ;;  %v1048_v34 = vsel %vm46_vm1, %v1047_v31, %v515_v30 }
 0x92f   :  { %518 = vrot.lane.b32.xlu0 %v517_v33, %s1537_s4 }
 0x9a1   :  { %v519_v35 = vpop.permute.xlu0 %518 }
 0x9a2   :  { %1309 = vmatmul.mubr.msk.f32.vlgmr.msra.gmra.mrb[6].mxu1 %vm207_vm5, %v519_v35 }
 0x9a3   :  { %1410 = vmatpush3.bf16.msra.mxu1 %v1630_v23  ;;  %1330 = vmatprep.mubr.msk.f32.mxu1 %vm1534_vm0, %v1535_v10 }
 0x9a4   :  { %1411 = vmatprep.subr.bf16.mxu1 %v1533_v4 }
 0x9a7   :  { %1413 = vmatpush3.bf16.msra.mxu1 %v1640_v26 }
 0x9a8   :  { %1420 = vmatprep.subr.bf16.mxu1 %v1533_v4 }
 0xa75   :  { %v588_v36 = vpop.f32.mrb[6].mxu1 }
 0xa76   :  { %v593_v37 = vrot.slane %v588_v36, 5  ;;  %v1310_v38 = vpop.f32.mrb[7].mxu1 }
 0xa78   :  { %v595_v39 = vadd.f32 %v593_v37, %v1660_v32 }
 0xa7a   :  { %1464 = vtanh.f32 %v595_v39  ;;  %v596_v41 = vsub.f32 0.0, %v595_v39 }
 0xa7c   :  { %v597_v42 = vmul.f32 1.442695, %v596_v41 }
 0xa7e   :  { %1466 = vpow2.f32 %v597_v42 }
 0xa84   :  { %v1465_v40 = vpop.eup %1464 }
 0xa85   :  { %607 = vrot.lane.b32.xlu1 %v1465_v40, %s1536_s27 }
 0xa88   :  { %v1467_v43 = vpop.eup %1466 }
 0xa89   :  { %v599_v44 = vadd.f32 1.0, %v1467_v43 }
 0xa8b   :  { %1468 = vrcp.f32 %v599_v44 }
 0xa95   :  { %v1469_v45 = vpop.eup %1468 }
 0xa96   :  { %v605_v49 = vmul.f32 %v1469_v45, %v603_v48 }
 0xaf7   :  { %v608_v46 = vpop.permute.xlu1 %607 }
 0xaf8   :  { %v610_v47 = vmul.f32 %v1469_v45, %v608_v46 }
 0xafa   :  { %612 = vrot.lane.b32.xlu0 %v610_v47, %s1537_s4 }
 0xb6c   :  { %v613_v50 = vpop.permute.xlu0 %612 }
 0xb6d   :  { %v615_v51 = vadd.f32 %v613_v50, %v605_v49 }
 0xb6f   :  { %1470 = vtanh.f32 %v615_v51  ;;  %v709_v7 = vrot.slane %v615_v51, 7 }
 0xb79   :  { %v1471_v52 = vpop.eup %1470 }
 0xb7a   :  { %618 = vrot.lane.b32.xlu1 %v1471_v52, %s1536_s27 }
 0xbec   :  { %v619_v53 = vpop.permute.xlu1 %618 }
 0xbed   :  { %v621_v54 = vmul.f32 %v1469_v45, %v619_v53 }
 0xbef   :  { %v623_v55 = vrot.slane %v621_v54, 3  ;;  %v1050_v56 = vsel %vm1049_vm7, %v1048_v34, %v621_v54 }
 0xbf1   :  { %624 = vrot.lane.b32.xlu0 %v623_v55, %s1537_s4 }
 0xc63   :  { %v625_v57 = vpop.permute.xlu0 %624 }
 0xc64   :  { %1320 = vmatmul.mubr.msk.f32.vlgmr.msra.gmra.mrb[4].mxu0 %vm207_vm5, %v625_v57 }
 0xc65   :  { %1416 = vmatpush3.bf16.msra.mxu0 %v1630_v23  ;;  %1341 = vmatprep.mubr.msk.f32.mxu0 %vm1534_vm0, %v1535_v10 }
 0xc66   :  { %1417 = vmatprep.subr.bf16.mxu0 %v1533_v4 }
 0xc69   :  { %1419 = vmatpush3.bf16.msra.mxu0 %v1640_v26 }
 0xc6a   :  { %1426 = vmatprep.subr.bf16.mxu0 %v1533_v4 }
 0xd37   :  { %v694_v58 = vpop.f32.mrb[4].mxu0 }
 0xd38   :  { %v699_v59 = vrot.slane %v694_v58, 4  ;;  %v1321_v60 = vpop.f32.mrb[5].mxu0 }
 0xd3a   :  { %v701_v61 = vadd.f32 %v699_v59, %v1660_v32 }
 0xd3c   :  { %1472 = vtanh.f32 %v701_v61  ;;  %v702_v63 = vsub.f32 0.0, %v701_v61 }
 0xd3e   :  { %v703_v0 = vmul.f32 1.442695, %v702_v63 }
 0xd40   :  { %1474 = vpow2.f32 %v703_v0 }
 0xd46   :  { %v1473_v62 = vpop.eup %1472 }
 0xd47   :  { %713 = vrot.lane.b32.xlu1 %v1473_v62, %s1536_s27 }
 0xd4a   :  { %v1475_v1 = vpop.eup %1474 }
 0xd4b   :  { %v705_v2 = vadd.f32 1.0, %v1475_v1 }
 0xd4d   :  { %1476 = vrcp.f32 %v705_v2 }
 0xd57   :  { %v1477_v3 = vpop.eup %1476 }
 0xd58   :  { %v711_v8 = vmul.f32 %v1477_v3, %v709_v7 }
 0xdb9   :  { %v714_v5 = vpop.permute.xlu1 %713 }
 0xdba   :  { %v716_v6 = vmul.f32 %v1477_v3, %v714_v5 }
 0xdbc   :  { %718 = vrot.lane.b32.xlu0 %v716_v6, %s1537_s4 }
 0xe2e   :  { %v719_v9 = vpop.permute.xlu0 %718 }
 0xe2f   :  { %v721_v11 = vadd.f32 %v719_v9, %v711_v8 }
 0xe31   :  { %1478 = vtanh.f32 %v721_v11 }
 0xe3b   :  { %v1479_v12 = vpop.eup %1478 }
 0xe3c   :  { %724 = vrot.lane.b32.xlu1 %v1479_v12, %s1536_s27 }
 0xeae   :  { %v725_v13 = vpop.permute.xlu1 %724 }
 0xeaf   :  { %v727_v14 = vmul.f32 %v1477_v3, %v725_v13 }
 0xeb1   :  { %v729_v15 = vrot.slane %v727_v14, 4  ;;  %v1052_v16 = vsel %vm1051_vm8, %v1050_v56, %v727_v14 }
 0xeb3   :  { %730 = vrot.lane.b32.xlu0 %v729_v15, %s1537_s4 }
 0xf25   :  { %v731_v17 = vpop.permute.xlu0 %730 }
 0xf26   :  { %1331 = vmatmul.mubr.msk.f32.vlgmr.msra.gmra.mrb[8].mxu1 %vm207_vm5, %v731_v17  ;;  %v1061_v17 = vld [vmem:[%s1782_s5 + $0x10] sm:$0xff] }
 0xf27   :  { %1422 = vmatpush3.bf16.msra.mxu1 %v1630_v23  ;;  %1352 = vmatprep.mubr.msk.f32.mxu1 %vm1534_vm0, %v1535_v10 }
 0xf28   :  { %1423 = vmatprep.subr.bf16.mxu1 %v1533_v4 }
 0xf2b   :  { %1425 = vmatpush3.bf16.msra.mxu1 %v1640_v26  ;;  %v815_v26 = vrot.slane %v721_v11, 7 }
 0xff9   :  { %v800_v18 = vpop.f32.mrb[8].mxu1 }
 0xffa   :  { %v805_v19 = vrot.slane %v800_v18, 3  ;;  %v1332_v20 = vpop.f32.mrb[9].mxu1 }
 0xffc   :  { %v807_v21 = vadd.f32 %v805_v19, %v1660_v32  ;;  %v1062_v19 = vld [vmem:[%s1782_s5 + $0x18] sm:$0xff] }
 0xffd   :  { %v1430_v20 = vpack.c.bf16 %v1062_v19, %v1061_v17 }
 0xffe   :  { %1480 = vtanh.f32 %v807_v21  ;;  %v808_v24 = vsub.f32 0.0, %v807_v21 }
0x1000   :  { %v809_v25 = vmul.f32 1.442695, %v808_v24 }
0x1002   :  { %1482 = vpow2.f32 %v809_v25 }
0x1008   :  { %v1481_v22 = vpop.eup %1480 }
0x1009   :  { %819 = vrot.lane.b32.xlu1 %v1481_v22, %s1536_s27 }
0x100c   :  { %v1483_v23 = vpop.eup %1482 }
0x100d   :  { %v811_v27 = vadd.f32 1.0, %v1483_v23 }
0x100f   :  { %1484 = vrcp.f32 %v811_v27  ;;  %v1185_v27 = vld [vmem:[%s1783_s6] ss:$0 sm:$0xff] }
0x1019   :  { %v1485_v28 = vpop.eup %1484 }
0x101a   :  { %v817_v31 = vmul.f32 %v1485_v28, %v815_v26 }
0x107b   :  { %v820_v29 = vpop.permute.xlu1 %819 }
0x107c   :  { %v822_v30 = vmul.f32 %v1485_v28, %v820_v29 }
0x107e   :  { %824 = vrot.lane.b32.xlu0 %v822_v30, %s1537_s4 }
0x10f0   :  { %v825_v33 = vpop.permute.xlu0 %824 }
0x10f1   :  { %v827_v34 = vadd.f32 %v825_v33, %v817_v31 }
0x10f3   :  { %1486 = vtanh.f32 %v827_v34 }
0x10fd   :  { %v1487_v35 = vpop.eup %1486 }
0x10fe   :  { %830 = vrot.lane.b32.xlu1 %v1487_v35, %s1536_s27 }
0x1170   :  { %v831_v36 = vpop.permute.xlu1 %830 }
0x1171   :  { %v833_v37 = vmul.f32 %v1485_v28, %v831_v36 }
0x1173   :  { %v835_v38 = vrot.slane %v833_v37, 5  ;;  %v1054_v39 = vsel %vm1053_vm9, %v1052_v16, %v833_v37  ;;  %v1060_v16 = vld [vmem:[%s1782_s5 + $0x8] sm:$0xff] }
0x1175   :  { %836 = vrot.lane.b32.xlu0 %v835_v38, %s1537_s4 }
0x11e7   :  { %v837_v40 = vpop.permute.xlu0 %836 }
0x11e8   :  { %1342 = vmatmul.mubr.msk.f32.vlgmr.msra.gmra.mrb[6].mxu0 %vm207_vm5, %v837_v40 }
0x11e9   :  { %1363 = vmatprep.mubr.msk.f32.mxu0 %vm1534_vm0, %v1535_v10  ;;  %v921_v10 = vrot.slane %v827_v34, 7 }
0x12bb   :  { %v906_v41 = vpop.f32.mrb[6].mxu0 }
0x12bc   :  { %v911_v42 = vrot.slane %v906_v41, 2  ;;  %v1343_v43 = vpop.f32.mrb[7].mxu0 }
0x12be   :  { %v913_v44 = vadd.f32 %v911_v42, %v1660_v32 }
0x12c0   :  { %1488 = vtanh.f32 %v913_v44  ;;  %v914_v46 = vsub.f32 0.0, %v913_v44 }
0x12c2   :  { %v915_v47 = vmul.f32 1.442695, %v914_v46 }
0x12c4   :  { %1490 = vpow2.f32 %v915_v47 }
0x12ca   :  { %v1489_v45 = vpop.eup %1488 }
0x12cb   :  { %925 = vrot.lane.b32.xlu1 %v1489_v45, %s1536_s27 }
0x12ce   :  { %v1491_v48 = vpop.eup %1490 }
0x12cf   :  { %v917_v49 = vadd.f32 1.0, %v1491_v48 }
0x12d1   :  { %1492 = vrcp.f32 %v917_v49 }
0x12db   :  { %v1493_v50 = vpop.eup %1492 }
0x12dc   :  { %v923_v53 = vmul.f32 %v1493_v50, %v921_v10 }
0x133d   :  { %v926_v51 = vpop.permute.xlu1 %925 }
0x133e   :  { %v928_v52 = vmul.f32 %v1493_v50, %v926_v51 }
0x1340   :  { %930 = vrot.lane.b32.xlu0 %v928_v52, %s1537_s4 }
0x13b2   :  { %v931_v54 = vpop.permute.xlu0 %930 }
0x13b3   :  { %v933_v55 = vadd.f32 %v931_v54, %v923_v53 }
0x13b5   :  { %1494 = vtanh.f32 %v933_v55  ;;  %v1027_v12 = vrot.slane %v933_v55, 7 }
0x13bf   :  { %v1495_v56 = vpop.eup %1494 }
0x13c0   :  { %936 = vrot.lane.b32.xlu1 %v1495_v56, %s1536_s27 }
0x1432   :  { %v937_v57 = vpop.permute.xlu1 %936 }
0x1433   :  { %v939_v58 = vmul.f32 %v1493_v50, %v937_v57 }
0x1435   :  { %v941_v59 = vrot.slane %v939_v58, 6  ;;  %v1056_v60 = vsel %vm1055_vm10, %v1054_v39, %v939_v58 }
0x1437   :  { %942 = vrot.lane.b32.xlu0 %v941_v59, %s1537_s4 }
0x14a9   :  { %v943_v61 = vpop.permute.xlu0 %942 }
0x14aa   :  { %1353 = vmatmul.mubr.msk.f32.vlgmr.msra.gmra.mrb[10].mxu1 %vm207_vm5, %v943_v61 }
0x157d   :  { %v1012_v62 = vpop.f32.mrb[10].mxu1 }
0x157e   :  { %v1017_v63 = vrot.slane %v1012_v62, 1  ;;  %v1354_v0 = vpop.f32.mrb[11].mxu1 }
0x1580   :  { %v1019_v1 = vadd.f32 %v1017_v63, %v1660_v32  ;;  %v1059_v32 = vld [vmem:[%s1782_s5] sm:$0xff]  ;;  %s1538_s5 = smov [#allocation2]  }
0x1581   :  { %v1427_v18 = vpack.c.bf16 %v1060_v16, %v1059_v32  ;;  %s1166_s6 = sshll.u32 %s1538_s5, 4  ;;  %s1167_s6 = int_to_ptr.vmem [resolvable:$true] %s1166_s6 }
0x1582   :  { %1496 = vtanh.f32 %v1019_v1  ;;  %v1020_v3 = vsub.f32 0.0, %v1019_v1  ;;  %s1508_s14 = scalar_lea.vmem %s1167_s6, 128  ;;  %p1513_p1 = scmp.lt.s32.totalorder %s1167_s6, %s1167_s6 }
0x1583   :  { %1428 = vmatpush3.bf16.msra.mxu0 %v1427_v18  ;;  %p1509_p0 = scmp.ne.s32.totalorder %s1167_s6, %s1508_s14  ;;  %p1514_p2 = scmp.lt.s32.totalorder %s1508_s14, %s1508_s14 }
0x1584   :  { %v1021_v5 = vmul.f32 1.442695, %v1020_v3  ;;  %1429 = vmatprep.subr.bf16.mxu0 %v1533_v4 }
0x1585   :  { %p1515_p3 = por %p1514_p2, %p1513_p1 }
0x1586   :  { %1498 = vpow2.f32 %v1021_v5 }
0x1587   :  { %1431 = vmatpush3.bf16.msra.mxu0 %v1430_v20  ;;  %p1516_p4 = pnand %p1515_p3, %p1509_p0 }
0x158c   :  { %v1497_v2 = vpop.eup %1496 }
0x158d   :  { %1031 = vrot.lane.b32.xlu1 %v1497_v2, %s1536_s27 }
0x1590   :  { %v1499_v6 = vpop.eup %1498 }
0x1591   :  { %v1023_v7 = vadd.f32 1.0, %v1499_v6 }
0x1593   :  { %1500 = vrcp.f32 %v1023_v7 }
0x159d   :  { %v1501_v8 = vpop.eup %1500 }
0x159e   :  { %v1029_v13 = vmul.f32 %v1501_v8, %v1027_v12 }
0x15ff   :  { %v1032_v9 = vpop.permute.xlu1 %1031 }
0x1600   :  { %v1034_v11 = vmul.f32 %v1501_v8, %v1032_v9 }
0x1602   :  { %1036 = vrot.lane.b32.xlu0 %v1034_v11, %s1537_s4 }
0x1674   :  { %v1037_v14 = vpop.permute.xlu0 %1036 }
0x1675   :  { %v1039_v15 = vadd.f32 %v1037_v14, %v1029_v13 }
0x1677   :  { %1502 = vtanh.f32 %v1039_v15 }
0x1681   :  { %v1503_v21 = vpop.eup %1502 }
0x1682   :  { %1042 = vrot.lane.b32.xlu1 %v1503_v21, %s1536_s27 }
0x16f4   :  { %v1043_v22 = vpop.permute.xlu1 %1042 }
0x16f5   :  { %v1045_v24 = vmul.f32 %v1501_v8, %v1043_v22 }
0x16f7   :  { %v1058_v25 = vsel %vm1057_vm11, %v1056_v60, %v1045_v24 }
0x16f8   :  { %1071 = vrot.lane.b32.xlu0 %v1058_v25, %s1537_s4 }
0x176a   :  { %v1072_v23 = vpop.permute.xlu0 %1071 }
0x176b   :  { %1364 = vmatmul.mubr.msk.f32.vlgmr.msra.gmra.mrb[8].mxu0 %vm207_vm5, %v1072_v23 }
0x183e   :  { %v1141_v28 = vpop.f32.mrb[8].mxu0 }
0x183f   :  { %v1142_v4 = vadd.f32 %v1185_v27, %v1141_v28  ;;  %v1365_v29 = vpop.f32.mrb[9].mxu0 }
0x1841   :  { %v1146_v30 = vsel %vm1145_vm12, %v1142_v4, -inf }
0x1842   :  { %1147 = vmax.xlane.f32.xlu1 %v1146_v30 }
0x18cf   :  { %v1148_v26 = vpop.xlane.xlu1 %1147 }
0x18d0   :  { %v1149_v31 = vsub.f32 %v1142_v4, %v1148_v26 }
0x18d2   :  { %v1150_v33 = vmul.f32 1.442695, %v1149_v31 }
0x18d4   :  { %1504 = vpow2.f32 %v1150_v33 }
0x18de   :  { %v1505_v34 = vpop.eup %1504 }
0x18df   :  { %v1152_v35 = vsel %vm1145_vm12, %v1505_v34, 0.0 }
0x18e0   :  { %1153 = vadd.xlane.f32.xlu0 %v1152_v35 }
0x196d   :  { %v1154_v36 = vpop.xlane.xlu0 %1153 }
0x196e   :  { %1506 = vlog2.f32 %v1154_v36 }
0x1978   :  { %v1507_v37 = vpop.eup %1506 }
0x1979   :  { %v1156_v38 = vmul.f32 0.6931472, %v1507_v37 }
0x197b   :  { %v1157_v39 = vadd.f32 %v1156_v38, %v1148_v26 }
0x197d   :  { %v1158_v40 = vsub.f32 %v1142_v4, %v1157_v39 }
0x197f   :  { %1159 = vst.msk [vmem:[#allocation2] sm:$0xff] %vm1145_vm12, %v1158_v40 }
0x1980   :  { %1519 = shalt.err (!%p1516_p4)
}
0x1981   :  { %s1520_s17 = scalar_lea.hbm %s1784_s7, 128 }
0x1982   :  { %p1521_p5 = scmp.ne.s32.totalorder %s1784_s7, %s1520_s17  ;;  %p1524_p6 = scmp.lt.u32.totalorder %s1520_s17, %s1784_s7 }
0x1984   :  { %p1526_p7 = pnand %p1524_p6, %p1521_p5 }
0x1986   :  { %1529 = shalt.err (!%p1526_p7)
}
0x1987   :  { %1169 = dma.vmem_to_hbm [thread:$0]  %s1167_s6, 128, %s1784_s7, [#allocation3]  }
0x1988   :  { %1530 = dma.done.wait [#allocation3], 128  }
0x1989   :  { %1531 = vsyncadd [#allocation3], 4294967168 }
0x198a   :  { %1173 = vsyncpa [#allocation3], 1 }

</bundles_post_ra>
